<compile_context>
chip_gen: v6e
topology: v6e:2x2x1
jax: 0.10.0
libtpu: 0.0.40
codegen_flags: <defaults>
</compile_context>

<pallas_src>
import jax
import jax.numpy as jnp
from jax import lax
from jax.experimental import pallas as pl
from jax.experimental.pallas import tpu as pltpu

_HALO = 128  # lane-aligned halo width (covers taps that cross a tile boundary)


def _round_up(x, m):
    return (x + m - 1) // m * m


def _conv_tap_kernel(x_ref, xh_ref, w_ref, b_ref, o_ref):
    """One (group, sample, L_out-tile) output block.

    Kernel-visible shapes (squeezed leading dims removed):
      x_ref : (stride, Ci_pad, TL)   stride-deinterleaved activation tile
      xh_ref: (stride, Ci_pad, 128)  halo = first 128 columns of tile j+1
      w_ref : (K, Co_g, Ci_pad)      per-group weights
      b_ref : (Co_g, 1)              bias (f32)
      o_ref : (Co_g, TL)             output tile, L_out on the lane axis
    """
    stride = x_ref.shape[0]
    tl = x_ref.shape[-1]
    ksize = w_ref.shape[0]

    full = [None] * stride           # lazily built (Ci_pad, TL + 128) per phase
    acc = None
    for k in range(ksize):           # static, unrolled tap loop
        ph, off = k % stride, k // stride
        if off == 0:
            x_tap = x_ref[ph]
        else:
            if full[ph] is None:
                full[ph] = jnp.concatenate([x_ref[ph], xh_ref[ph]], axis=-1)
            x_tap = full[ph][:, off:off + tl]
        part = jnp.dot(w_ref[k], x_tap, preferred_element_type=jnp.float32)
        acc = part if acc is None else acc + part
    o_ref[...] = (acc + b_ref[...]).astype(o_ref.dtype)


def _vmem_limit_bytes():
    cap = 64 * 1024 * 1024  # conservative default = v7x physical VMEM
    try:
        cap = int(getattr(pltpu.get_tpu_info(), "vmem_capacity_bytes", cap))
    except Exception:
        pass
    # 3/4 of physical, capped: ~48 MiB on v7x, ~96 MiB on v5e/v6e.
    return int(min(cap * 3 // 4, 96 * 1024 * 1024))


def _pick_tile_l(l_out, ci_pad, c_out_g, stride, in_itemsize):
    """Lane-tile length: as large as a ~8 MiB double-buffered x/out budget allows."""
    per_lane = 2 * (stride * ci_pad * in_itemsize) + 2 * (c_out_g * 4)
    tl = (8 * 1024 * 1024) // max(per_lane, 1)
    tl = max(128, min(2048, (tl // 128) * 128))
    return min(tl, _round_up(l_out, 128))


def conv1d_pad_same(x, weight, bias, *, stride, groups=1,
                    compute_dtype=jnp.bfloat16, tile_l=None):
    """Exact equivalent of MyConv1dPadSame.forward (bf16 compute, f32 accumulation).

    x: (N, C_in, L); weight: (C_out, C_in // groups, K); bias: (C_out,)
    Returns (N, C_out, ceil(L / stride)).
    """
    n, c_in, length = x.shape
    c_out, c_in_g, ksize = weight.shape
    assert c_in % groups == 0 and c_out % groups == 0
    assert c_in_g == c_in // groups
    c_out_g = c_out // groups
    out_dtype = x.dtype

    # SAME padding exactly as the PyTorch module computes it.
    out_dim = (length + stride - 1) // stride
    p = max(0, (out_dim - 1) * stride + ksize - length)
    pad_left = p // 2
    l_out = (length + p - ksize) // stride + 1          # actual Conv1d output length

    assert (ksize - 1) // stride <= _HALO, "kernel_size too large for the halo width"

    # Tile / padded-geometry selection.
    ci_pad = _round_up(c_in_g, 8)                       # sublane-friendly contraction dim
    itemsize = jnp.dtype(compute_dtype).itemsize
    tl = tile_l if tile_l is not None else _pick_tile_l(l_out, ci_pad, c_out_g,
                                                        stride, itemsize)
    tl = max(128, _round_up(tl, 128))
    n_tiles = pl.cdiv(l_out, tl)
    t_tot = n_tiles * tl + _HALO                        # deinterleaved length per phase
    l_tot = t_tot * stride                              # total padded input length

    # Zero-pad (SAME left pad + enough right zeros for full tiles & halo), cast,
    # and stride-deinterleave: x5[n,g,ph,c,t] = x_pad[n, g*Ci+c, t*stride + ph].
    xp = jnp.pad(x.astype(compute_dtype),
                 ((0, 0), (0, 0), (pad_left, l_tot - length - pad_left)))
    if stride == 1:
        x5 = xp.reshape(n, groups, c_in_g, 1, t_tot).transpose(0, 1, 3, 2, 4)
    else:
        x5 = xp.reshape(n, groups, c_in_g, t_tot, stride).transpose(0, 1, 4, 2, 3)
    if ci_pad != c_in_g:
        x5 = jnp.pad(x5, ((0, 0), (0, 0), (0, 0), (0, ci_pad - c_in_g), (0, 0)))

    # Weights -> (G, K, Co_g, Ci_pad) so w_ref[k] is the tap-k matmul LHS; bias -> (G, Co_g, 1).
    wt = weight.astype(compute_dtype).reshape(groups, c_out_g, c_in_g, ksize)
    wt = wt.transpose(0, 3, 1, 2)
    if ci_pad != c_in_g:
        wt = jnp.pad(wt, ((0, 0), (0, 0), (0, 0), (0, ci_pad - c_in_g)))
    b3 = bias.astype(jnp.float32).reshape(groups, c_out_g, 1)

    halo_blk = tl // _HALO  # halo block index multiplier (element offset (j+1)*tl)

    grid = (groups, n, n_tiles)
    x_spec = pl.BlockSpec((None, None, stride, ci_pad, tl),
                          lambda g, b, j: (b, g, 0, 0, j))
    xh_spec = pl.BlockSpec((None, None, stride, ci_pad, _HALO),
                           lambda g, b, j: (b, g, 0, 0, (j + 1) * halo_blk))
    w_spec = pl.BlockSpec((None, ksize, c_out_g, ci_pad),
                          lambda g, b, j: (g, 0, 0, 0))
    b_spec = pl.BlockSpec((None, c_out_g, 1), lambda g, b, j: (g, 0, 0))
    o_spec = pl.BlockSpec((None, None, c_out_g, tl), lambda g, b, j: (b, g, 0, j))

    cost = pl.CostEstimate(
        flops=2 * n * c_out * c_in_g * ksize * l_out,
        transcendentals=0,
        bytes_accessed=int(x5.size * itemsize + wt.size * itemsize + bias.size * 4
                           + n * c_out * l_out * jnp.dtype(out_dtype).itemsize),
    )

    out5 = pl.pallas_call(
        _conv_tap_kernel,
        grid=grid,
        in_specs=[x_spec, xh_spec, w_spec, b_spec],
        out_specs=o_spec,
        out_shape=jax.ShapeDtypeStruct((n, groups, c_out_g, l_out), out_dtype),
        compiler_params=pltpu.CompilerParams(
            dimension_semantics=("parallel", "parallel", "parallel"),
            vmem_limit_bytes=_vmem_limit_bytes(),
        ),
        cost_estimate=cost,
    )(x5, x5, wt, b3)

    # (N, G, Co_g, L_out) -> (N, C_out, L_out): contiguous reshape, no data movement.
    return out5.reshape(n, c_out, l_out)


def _reference(x, weight, bias, stride, groups):
    # Independent pure-JAX reference mirroring the PyTorch forward.
    n, c_in, length = x.shape
    ksize = weight.shape[-1]
    out_dim = (length + stride - 1) // stride
    p = max(0, (out_dim - 1) * stride + ksize - length)
    pad_left = p // 2
    pad_right = p - pad_left
    y = lax.conv_general_dilated(
        x, weight,
        window_strides=(stride,),
        padding=[(pad_left, pad_right)],
        dimension_numbers=("NCH", "OIH", "NCH"),
        feature_group_count=groups,
    )
    return y + bias[None, :, None]


if __name__ == "__main__":
    base_key = jax.random.PRNGKey(0)

    def check(case, *, n, c_in, c_out, l, ksize, stride, groups,
              tile_l=None, rtol=5e-2, atol=5e-2):
        k1, k2, k3 = jax.random.split(jax.random.fold_in(base_key, case), 3)
        x = jax.random.normal(k1, (n, c_in, l), dtype=jnp.float32)
        w = jax.random.normal(k2, (c_out, c_in // groups, ksize),
                              dtype=jnp.float32) * 0.3
        b = jax.random.normal(k3, (c_out,), dtype=jnp.float32) * 0.1

        out = conv1d_pad_same(x, w, b, stride=stride, groups=groups, tile_l=tile_l)
        out = jax.block_until_ready(out)

        ref = _reference(x, w, b, stride, groups)
        assert out.shape == ref.shape, (out.shape, ref.shape)
        err = float(jnp.max(jnp.abs(out - ref)))
        assert jnp.allclose(out, ref, rtol=rtol, atol=atol), \
            f"case {case}: mismatch vs reference (max abs err {err})"

    # Small shapes consistent with (n_sample, in_channels, n_length).
    check(0, n=2, c_in=4, c_out=8, l=16, ksize=3, stride=2, groups=1)
    # Grouped conv, stride 1, multi-tile output (exercises the cross-tile halo path).
    check(1, n=2, c_in=6, c_out=16, l=300, ksize=5, stride=1, groups=2, tile_l=128)

    print("KERNEL_OK")
</pallas_src>

<mosaic_0001>
module attributes {stable_mosaic.version = 11 : i64} {
  func.func @_conv_tap_kernel(%arg0: i32, %arg1: i32, %arg2: i32, %arg3: memref<1x1x2x8x128xbf16, #tpu.memory_space<vmem>>, %arg4: memref<1x1x2x8x128xbf16, #tpu.memory_space<vmem>>, %arg5: memref<1x3x8x8xbf16, #tpu.memory_space<vmem>>, %arg6: memref<1x8x1xf32, #tpu.memory_space<vmem>>, %arg7: memref<1x1x8x128xf32, #tpu.memory_space<vmem>>) attributes {dimension_semantics = [#tpu.dimension_semantics<parallel>, #tpu.dimension_semantics<parallel>, #tpu.dimension_semantics<parallel>], iteration_bounds = array<i64: 1, 2, 1>, scalar_prefetch = 0 : i64, scratch_operands = 0 : i64, tpu.core_type = #tpu.core_type<tc>, window_params = [{transform_indices = @transform_0, window_bounds = array<i64: 1, 1, 2, 8, 128>}, {transform_indices = @transform_1, window_bounds = array<i64: 1, 1, 2, 8, 128>}, {transform_indices = @transform_2, window_bounds = array<i64: 1, 3, 8, 8>}, {transform_indices = @transform_3, window_bounds = array<i64: 1, 8, 1>}, {transform_indices = @transform_4, window_bounds = array<i64: 1, 1, 8, 128>}]} {
    %c0 = arith.constant 0 : index
    %c0_0 = arith.constant 0 : index
    %c0_1 = arith.constant 0 : index
    %c0_2 = arith.constant 0 : index
    %c0_3 = arith.constant 0 : index
    %0 = vector.load %arg3[%c0, %c0_0, %c0_1, %c0_2, %c0_3] : memref<1x1x2x8x128xbf16, #tpu.memory_space<vmem>>, vector<1x1x1x8x128xbf16>
    %1 = vector.shape_cast %0 : vector<1x1x1x8x128xbf16> to vector<8x128xbf16>
    %c0_4 = arith.constant 0 : index
    %c0_5 = arith.constant 0 : index
    %c0_6 = arith.constant 0 : index
    %c0_7 = arith.constant 0 : index
    %2 = vector.load %arg5[%c0_4, %c0_5, %c0_6, %c0_7] : memref<1x3x8x8xbf16, #tpu.memory_space<vmem>>, vector<1x1x8x8xbf16>
    %3 = vector.shape_cast %2 : vector<1x1x8x8xbf16> to vector<8x8xbf16>
    %cst = arith.constant dense<0.000000e+00> : vector<8x128xf32>
    %4 = tpu.matmul %3, %1, %cst {dimension_numbers = #tpu.dot_dimension_numbers<[1], [0], [0], [1], [0, 0, 1, 1], [], []>} : vector<8x8xbf16>, vector<8x128xbf16>, vector<8x128xf32> -> vector<8x128xf32>
    %c0_8 = arith.constant 0 : index
    %c0_9 = arith.constant 0 : index
    %c1 = arith.constant 1 : index
    %c0_10 = arith.constant 0 : index
    %c0_11 = arith.constant 0 : index
    %5 = vector.load %arg3[%c0_8, %c0_9, %c1, %c0_10, %c0_11] : memref<1x1x2x8x128xbf16, #tpu.memory_space<vmem>>, vector<1x1x1x8x128xbf16>
    %6 = vector.shape_cast %5 : vector<1x1x1x8x128xbf16> to vector<8x128xbf16>
    %c0_12 = arith.constant 0 : index
    %c1_13 = arith.constant 1 : index
    %c0_14 = arith.constant 0 : index
    %c0_15 = arith.constant 0 : index
    %7 = vector.load %arg5[%c0_12, %c1_13, %c0_14, %c0_15] : memref<1x3x8x8xbf16, #tpu.memory_space<vmem>>, vector<1x1x8x8xbf16>
    %8 = vector.shape_cast %7 : vector<1x1x8x8xbf16> to vector<8x8xbf16>
    %cst_16 = arith.constant dense<0.000000e+00> : vector<8x128xf32>
    %9 = tpu.matmul %8, %6, %cst_16 {dimension_numbers = #tpu.dot_dimension_numbers<[1], [0], [0], [1], [0, 0, 1, 1], [], []>} : vector<8x8xbf16>, vector<8x128xbf16>, vector<8x128xf32> -> vector<8x128xf32>
    %10 = arith.addf %4, %9 : vector<8x128xf32>
    %c0_17 = arith.constant 0 : index
    %c0_18 = arith.constant 0 : index
    %c0_19 = arith.constant 0 : index
    %c0_20 = arith.constant 0 : index
    %c0_21 = arith.constant 0 : index
    %11 = vector.load %arg3[%c0_17, %c0_18, %c0_19, %c0_20, %c0_21] : memref<1x1x2x8x128xbf16, #tpu.memory_space<vmem>>, vector<1x1x1x8x128xbf16>
    %12 = vector.shape_cast %11 : vector<1x1x1x8x128xbf16> to vector<8x128xbf16>
    %c0_22 = arith.constant 0 : index
    %c0_23 = arith.constant 0 : index
    %c0_24 = arith.constant 0 : index
    %c0_25 = arith.constant 0 : index
    %c0_26 = arith.constant 0 : index
    %13 = vector.load %arg4[%c0_22, %c0_23, %c0_24, %c0_25, %c0_26] : memref<1x1x2x8x128xbf16, #tpu.memory_space<vmem>>, vector<1x1x1x8x128xbf16>
    %14 = vector.shape_cast %13 : vector<1x1x1x8x128xbf16> to vector<8x128xbf16>
    %15 = tpu.concatenate %12, %14 in 1 : vector<8x128xbf16>, vector<8x128xbf16> -> vector<8x256xbf16>
    %16 = vector.extract_strided_slice %15 {offsets = [0, 1], sizes = [8, 128], strides = [1, 1]} : vector<8x256xbf16> to vector<8x128xbf16>
    %c0_27 = arith.constant 0 : index
    %c2 = arith.constant 2 : index
    %c0_28 = arith.constant 0 : index
    %c0_29 = arith.constant 0 : index
    %17 = vector.load %arg5[%c0_27, %c2, %c0_28, %c0_29] : memref<1x3x8x8xbf16, #tpu.memory_space<vmem>>, vector<1x1x8x8xbf16>
    %18 = vector.shape_cast %17 : vector<1x1x8x8xbf16> to vector<8x8xbf16>
    %cst_30 = arith.constant dense<0.000000e+00> : vector<8x128xf32>
    %19 = tpu.matmul %18, %16, %cst_30 {dimension_numbers = #tpu.dot_dimension_numbers<[1], [0], [0], [1], [0, 0, 1, 1], [], []>} : vector<8x8xbf16>, vector<8x128xbf16>, vector<8x128xf32> -> vector<8x128xf32>
    %20 = arith.addf %10, %19 : vector<8x128xf32>
    %c0_31 = arith.constant 0 : index
    %c0_32 = arith.constant 0 : index
    %c0_33 = arith.constant 0 : index
    %21 = vector.load %arg6[%c0_31, %c0_32, %c0_33] : memref<1x8x1xf32, #tpu.memory_space<vmem>>, vector<1x8x1xf32>
    %22 = vector.shape_cast %21 : vector<1x8x1xf32> to vector<8x1xf32>
    %23 = vector.broadcast %22 : vector<8x1xf32> to vector<8x128xf32>
    %24 = arith.addf %20, %23 : vector<8x128xf32>
    %c0_34 = arith.constant 0 : index
    %c0_35 = arith.constant 0 : index
    %c0_36 = arith.constant 0 : index
    %c0_37 = arith.constant 0 : index
    %25 = vector.load %arg7[%c0_34, %c0_35, %c0_36, %c0_37] : memref<1x1x8x128xf32, #tpu.memory_space<vmem>>, vector<1x1x8x128xf32>
    %26 = vector.shape_cast %25 : vector<1x1x8x128xf32> to vector<8x128xf32>
    %27 = vector.shape_cast %24 : vector<8x128xf32> to vector<1x1x8x128xf32>
    tpu.vector_store %arg7[%c0_34, %c0_35, %c0_36, %c0_37], %27 {strides = array<i32>} : memref<1x1x8x128xf32, #tpu.memory_space<vmem>>, vector<1x1x8x128xf32>,
    return
  }
  func.func @transform_0(%arg0: i32, %arg1: i32, %arg2: i32) -> (i32, i32, i32, i32, i32) {
    %c0_i32 = arith.constant 0 : i32
    %c0_i32_0 = arith.constant 0 : i32
    %c0_i32_1 = arith.constant 0 : i32
    return %arg1, %arg0, %c0_i32, %c0_i32_0, %arg2 : i32, i32, i32, i32, i32
  }
  func.func @transform_1(%arg0: i32, %arg1: i32, %arg2: i32) -> (i32, i32, i32, i32, i32) {
    %c1_i32 = arith.constant 1 : i32
    %0 = arith.addi %arg2, %c1_i32 : i32
    %c1_i32_0 = arith.constant 1 : i32
    %1 = arith.muli %0, %c1_i32_0 : i32
    %c0_i32 = arith.constant 0 : i32
    %c0_i32_1 = arith.constant 0 : i32
    %c0_i32_2 = arith.constant 0 : i32
    return %arg1, %arg0, %c0_i32, %c0_i32_1, %1 : i32, i32, i32, i32, i32
  }
  func.func @transform_2(%arg0: i32, %arg1: i32, %arg2: i32) -> (i32, i32, i32, i32) {
    %c0_i32 = arith.constant 0 : i32
    %c0_i32_0 = arith.constant 0 : i32
    %c0_i32_1 = arith.constant 0 : i32
    %c0_i32_2 = arith.constant 0 : i32
    return %arg0, %c0_i32, %c0_i32_0, %c0_i32_1 : i32, i32, i32, i32
  }
  func.func @transform_3(%arg0: i32, %arg1: i32, %arg2: i32) -> (i32, i32, i32) {
    %c0_i32 = arith.constant 0 : i32
    %c0_i32_0 = arith.constant 0 : i32
    %c0_i32_1 = arith.constant 0 : i32
    return %arg0, %c0_i32, %c0_i32_0 : i32, i32, i32
  }
  func.func @transform_4(%arg0: i32, %arg1: i32, %arg2: i32) -> (i32, i32, i32, i32) {
    %c0_i32 = arith.constant 0 : i32
    %c0_i32_0 = arith.constant 0 : i32
    return %arg1, %arg0, %c0_i32, %arg2 : i32, i32, i32, i32
  }
}

</mosaic_0001>

<bundles_post_ra>
// kernel: tpu_custom_call.1
= control target key start
LH: loop header
LB: loop body
LE: loop exit
PB: predicated region body
PF: predicated region fallthrough
CT: control target
= control target key end

     0   :  { %s1175_s0 = inlined_call_operand.hbm [shape: bf16[2,1,2,8,256], index: 0, kind: input, shape index: {}]   ;;  %s1176_s1 = inlined_call_operand.hbm [shape: bf16[2,1,2,8,256], index: 1, kind: input, shape index: {}]   ;;  %s1177_s2 = inlined_call_operand.vmem [shape: bf16[1,3,8,8], index: 2, kind: input, shape index: {}]   ;;  %s1178_s3 = inlined_call_operand.vmem [shape: f32[1,8,1], index: 3, kind: input, shape index: {}]   ;;  %s1179_s4 = inlined_call_operand.hbm [shape: f32[2,1,8,8], index: 4, kind: output, shape index: {}]  }
   0x1   :  { %1182 = sst [smem:[#allocation14_spill]] %s1175_s0 }
   0x2   :  { %9 = vsyncpa [#allocation3], 0 }
   0x3   :  { %11 = vsyncpa [#allocation3 + $0x1], 0 }
   0x4   :  { %12 = vsyncpa [#allocation6], 0 }
   0x5   :  { %14 = vsyncpa [#allocation6 + $0x1], 0 }
   0x6   :  { %15 = vsyncpa [#allocation4], 0 }
   0x7   :  { %17 = vsyncpa [#allocation4 + $0x1], 0  ;;  %s968_s15 = smov 0   ;;  %s970_s16 = smov 0  }
   0x8   :  { %s972_s17 = smov 0   ;;  %s974_s18 = smov 0  }
   0x9   :  { %s976_s19 = smov 0   ;;  %s978_s20 = smov 0  }
   0xa LB: > { %1183 = sst [smem:[#allocation11_spill]] %s919_s17  ;;  %s662_s21 = sadd.s32 4294967295, %s931_s20   ;;  %s931_s20 = sphi %s978_s20, %s23_s20   ;;  %s927_s19 = sphi %s976_s19, %s1199_s19   ;;  %s923_s18 = sphi %s974_s18, %s1198_s18   ;;  %s919_s17 = sphi %s972_s17, %s1194_s17   ;;  %s915_s16 = sphi %s970_s16, %s1197_s16   ;;  %s911_s15 = sphi %s968_s15, %s1196_s15  }
   0xb   : > { %s663_s22 = sadd.s32 4294967294, %s931_s20   ;;  %s38_s23 = sadd.s32 1, %s927_s19 }
   0xc   : > { %s53_s24 = sadd.s32 1, %s919_s17  ;;  %p40_p0 = scmp.ge.s32.totalorder %s38_s23, 2 }
   0xd   : > { %p60_p1 = scmp.ne.s32.totalorder %s919_s17, %s915_s16  ;;  %p61_p2 = scmp.eq.s32.totalorder %s931_s20, 0 }
   0xe   : > { %p66_p3 = scmp.ne.s32.totalorder %s915_s16, %s911_s15  ;;  %s1201_s23 = smov (%p40_p0, %s38_s23), 0 }
   0xf   : > { %1184 = sst [smem:[#allocation12_spill]] %s1201_s23  ;;  %p1009_p4 = por %p61_p2, %p60_p1 }
  0x10   : > { %p67_p5 = scmp.eq.s32.totalorder %s662_s21, 0  ;;  %s46_s26 = ssub.s32 %s927_s19, %s1201_s23 }
  0x11   : > { %p178_p6 = scmp.eq.s32.totalorder %s662_s21, 1  ;;  %p51_p7 = scmp.eq.s32.totalorder %s46_s26, 0 }
  0x12   : > { %p1015_p8 = por %p67_p5, %p66_p3  ;;  %p184_p10 = scmp.eq.s32.totalorder %s663_s22, 1 }
  0x13   : > { %p1019_p9 = por %p178_p6, %p60_p1  ;;  %p667_p12 = scmp.ge.s32.totalorder %s931_s20, 2 }
  0x14   : > { %s1024_s29 = scalar_select %p51_p7, %s919_s17, %s53_s24  }
  0x15   : > { %p1026_p11 = por %p184_p10, %p66_p3  ;;  %p731_p13 = scmp.lt.s32.totalorder %s931_s20, 2 }
  0x16   : > { %1188 = sst [smem:[#allocation13_spill]] %s1024_s29  ;;  %s1033_s5 = sand.u32 1, %s919_s17  }
  0x17   : > { %s668_s6 = sshll.u32 %s1033_s5, 3  ;;  %s688_s7 = sshll.u32 %s927_s19, 8 }
  0x18   : > { %s1190_s0 = sld [smem:[#allocation14_spill]]  ;;  %s223_s11 = scalar_lea.vmem [#allocation2], %s668_s6 }
  0x19   : > { %s233_s12 = sshll.u32 %s223_s11, 4  ;;  %p1046_p0 = pnand %p731_p13, %p1009_p4  ;;  %s234_s12 = int_to_ptr.vmem [resolvable:$true] %s233_s12 }
  0x1a   : > { %s220_s14 = scalar_lea.sflag [#allocation3], %s1033_s5  ;;  %s803_s21 = scalar_lea.vmem %s234_s12, 128 }
  0x1b   : > { %p792_p1 = pneg %p1046_p0  ;;  %p804_p2 = scmp.ne.s32.totalorder %s234_s12, %s803_s21 }
  0x1c   : > { %s933_s22 = smov [#allocation2]  }
  0x1d   : > { %p806_p3 = pnand %p804_p2, %p792_p1  ;;  %s808_s24 = sshll.u32 %s933_s22, 4  ;;  %s809_s24 = int_to_ptr.vmem [resolvable:$false] %s808_s24 }
  0x1e   : > { %s232_s10 = scalar_lea.hbm %s1190_s0, %s688_s7  ;;  %s810_s26 = scalar_lea.vmem %s809_s24, 256 }
  0x1f   : > { %p807_p5 = pneg %p806_p3  ;;  %p811_p6 = scmp.lt.s32.totalorder %s234_s12, %s809_s24 }
  0x20   : > { %p812_p4 = scmp.lt.s32.totalorder %s810_s26, %s803_s21 }
  0x22   : > { %p813_p7 = por %p812_p4, %p811_p6 }
  0x24   : > { %p814_p10 = pnand %p813_p7, %p807_p5 }
  0x26   : > { %817 = shalt.err (!%p814_p10)
}
  0x27   : > { %s934_s25 = smov 128   ;;  %s935_s8 = smov 64  }
  0x28   : > { %s936_s9 = smov 4   ;;  %p674_p13 = scmp.ge.s32.totalorder %s931_s20, 1 }
  0x29   : > { %723 = dma.hbm_to_vmem [thread:$0]  (!%p1046_p0), %s232_s10, 128, %s234_s12, %s220_s14, %s934_s25, %s935_s8, %s936_s9  }
  0x2a   : > { %p266_p2 = scmp.lt.s32.totalorder %s931_s20, 3  ;;  %s565_s24 = scalar_lea.hbm %s1176_s1, %s688_s7 }
  0x2b   : > { %s566_s26 = scalar_lea.hbm %s565_s24, 64  ;;  %s247_s0 = scalar_lea.vmem [#allocation5], %s668_s6 }
  0x2c   : > { %p1062_p3 = pnand %p674_p13, %p266_p2  ;;  %s258_s23 = sshll.u32 %s247_s0, 4  ;;  %s259_s23 = int_to_ptr.vmem [resolvable:$true] %s258_s23 }
  0x2d   : > { %s244_s29 = scalar_lea.sflag [#allocation6], %s1033_s5  ;;  %s831_s17 = scalar_lea.vmem %s259_s23, 128 }
  0x2e   : > { %p832_p5 = scmp.ne.s32.totalorder %s259_s23, %s831_s17  ;;  %s937_s10 = smov [#allocation5]  }
  0x2f   : > { %s836_s12 = sshll.u32 %s937_s10, 4  ;;  %s837_s12 = int_to_ptr.vmem [resolvable:$false] %s836_s12 }
  0x30   : > { %p834_p6 = pnand %p832_p5, %p792_p1  ;;  %s838_s14 = scalar_lea.vmem %s837_s12, 256 }
  0x31   : > { %p839_p7 = scmp.lt.s32.totalorder %s259_s23, %s837_s12  ;;  %p840_p10 = scmp.lt.s32.totalorder %s838_s14, %s831_s17 }
  0x32   : > { %p835_p4 = pneg %p834_p6 }
  0x33   : > { %p841_p13 = por %p840_p10, %p839_p7 }
  0x35   : > { %p842_p2 = pnand %p841_p13, %p835_p4 }
  0x37   : > { %845 = shalt.err (!%p842_p2)
}
  0x38   : > { %726 = dma.hbm_to_vmem [thread:$0]  (!%p1046_p0), %s566_s26, 128, %s259_s23, %s244_s29, %s934_s25, %s935_s8, %s936_s9  }
  0x39   : > { %270 = sbr.rel (%p1062_p3) target bundleno = 404 (0x194), region = 36  ;;  %s1084_s0 = sand.u32 (!%p1062_p3), 1, %s915_s16  }
  0x3a   : > { %s1087_s5 = sshll.u32 (!%p1062_p3), %s1084_s0, 3  ;;  %s273_s17 = scalar_lea.sflag (!%p1062_p3), [#allocation3], %s1084_s0 }
  0x3b   : > { %s276_s6 = scalar_lea.vmem (!%p1062_p3), [#allocation2], %s1087_s5 }
  0x3e   : > { %898 = dma.done.wait (%p1015_p8), %s273_s17, 128  }
  0x3f   : > { %900 = vsyncadd (%p1015_p8), %s273_s17, 4294967168  ;;  %s282_s23 = scalar_lea.sflag [#allocation6], %s1084_s0  ;;  %s285_s29 = scalar_lea.vmem [#allocation5], %s1087_s5 }
  0x40   : > { %902 = dma.done.wait (%p1015_p8), %s282_s23, 128  }
  0x41   : > { %904 = vsyncadd (%p1015_p8), %s282_s23, 4294967168  ;;  %v938_v0 = vmov 0.0   ;;  %vm939_vm0 = vmmov 0   ;;  %vm345_vm1 = vcmask 1043456   ;;  %v940_v1 = vmov 0   ;;  %s941_s7 = smov 127  }
  0x42   : > { %696 = vmatprep.subr.bf16.mxu0 %v938_v0  ;;  %698 = vmatprep.mubr.msk.bf16.mxu0 %vm939_vm0, %v938_v0  ;;  %v335_v2 = vld [vmem:[%s276_s6] sm:$0xf]  ;;  %v678_v3 = vld [vmem:[%s276_s6 + $0x4] sm:$0xf]  ;;  %v435_v6 = vld [vmem:[%s285_s29] sm:$0xf] }
  0x43   : > { %702 = vmatprep.subr.bf16.mxu1 %v938_v0  ;;  %704 = vmatprep.mubr.msk.bf16.mxu1 %vm939_vm0, %v938_v0  ;;  %v347_v4 = vsel %vm345_vm1, %v678_v3, 0  ;;  %v393_v5 = vsel %vm345_vm1, %v335_v2, 0  ;;  %v679_v7 = vld [vmem:[%s1177_s2 + $0x4] sm:$0xf]  ;;  %vm341_vm2 = vcmask 64512   ;;  %vm444_vm3 = vcmask 1039360  }
  0x44   : > { %788 = vset.pattern.permute.xlu1 %v940_v1  ;;  %789 = vset.pattern.permute.xlu0 %v940_v1  ;;  %v493_v8 = vld [vmem:[%s1178_s3] sm:$0xff]  ;;  %v682_v14 = vld [vmem:[%s1177_s2 + $0x8] sm:$0xf]  ;;  %s685_s24 = sshll.u32 %s923_s18, 7  ;;  %s323_s26 = scalar_lea.vmem [#allocation7], %s1087_s5 }
  0x45   : > { %440 = vrot.lane.b32.xlu0 %v335_v2, %s941_s7  ;;  %697 = vmatpush3.bf16.msra.mxu0 %v347_v4  ;;  %v336_v9 = vld [vmem:[%s1177_s2] sm:$0xf]  ;;  %s517_s10 = sshll.u32 %s323_s26, 4  ;;  %s1127_s17 = scalar_lea.hbm %s1179_s4, %s685_s24  ;;  %s1129_s10 = int_to_ptr.vmem [resolvable:$true] %s517_s10 }
  0x46   : > { %703 = vmatpush3.bf16.msra.mxu1 %v393_v5  ;;  %708 = vmatprep.subr.bf16.mxu0 %v938_v0  ;;  %s502_s6 = scalar_lea.sflag [#allocation4], %s1084_s0  ;;  %s847_s18 = scalar_lea.vmem %s1129_s10, 128 }
  0x47   : > { %496 = vperm.xlu1 %788, %v493_v8   ;;  %p848_p8 = scmp.ne.s32.totalorder %s1129_s10, %s847_s18  ;;  %s942_s5 = smov [#allocation7]  }
  0x48   : > { %699 = vmatmul.mubr.msk.bf16.vlgmr.msra.gmra.mxu0 %vm341_vm2, %v679_v7  ;;  %s851_s23 = sshll.u32 %s942_s5, 4  ;;  %s852_s23 = int_to_ptr.vmem [resolvable:$false] %s851_s23 }
  0x49   : > { %442 = vrot.lane.b32.xlu0 %v435_v6, %s941_s7  ;;  %705 = vmatmul.mubr.msk.bf16.vlgmr.msra.gmra.mxu1 %vm341_vm2, %v336_v9  ;;  %p849_p0 = pnand %p848_p8, %p1019_p9  ;;  %s853_s29 = scalar_lea.vmem %s852_s23, 256 }
  0x4a   : > { %710 = vmatprep.mubr.msk.bf16.mxu0 %vm939_vm0, %v938_v0  ;;  %p854_p3 = scmp.lt.s32.totalorder %s1129_s10, %s852_s23  ;;  %p855_p5 = scmp.lt.s32.totalorder %s853_s29, %s847_s18 }
  0x4b   : > { %p850_p1 = pneg %p849_p0 }
  0x4c   : > { %p856_p6 = por %p855_p5, %p854_p3 }
  0x4e   : > { %p857_p4 = pnand %p856_p6, %p850_p1 }
  0xb7   : > { %v441_v10 = vpop.permute.xlu0 %440 }
  0xbb   : > { %v443_v11 = vpop.permute.xlu0 %442 }
  0xbc   : > { %v445_v12 = vsel %vm444_vm3, %v441_v10, %v443_v11 }
  0xbd   : > { %v450_v13 = vsel %vm345_vm1, %v445_v12, 0 }
  0xbe   : > { %709 = vmatpush3.bf16.msra.mxu0 %v450_v13 }
  0xc1   : > { %711 = vmatmul.mubr.msk.bf16.vlgmr.msra.gmra.mxu0 %vm341_vm2, %v682_v14 }
  0xc2   : > { %v497_v25 = vpop.permute.xlu1 %496 }
 0x108   : > { %v383_v15 = vpop.f32.mrf.mxu0 }
 0x109   : > { %v429_v16 = vpop.f32.mrf.mxu1 }
 0x10a   : > { %v700_v17 = vpop.f32.mrf.mxu0  ;;  %v430_v18 = vadd.f32 %v429_v16, %v383_v15 }
 0x10b   : > { %v706_v19 = vpop.f32.mrf.mxu1 }
 0x10c   : > { %v386_v20 = vpop.f32.mrf.mxu0 }
 0x10d   : > { %v432_v21 = vpop.f32.mrf.mxu1 }
 0x10e   : > { %v701_v22 = vpop.f32.mrf.mxu0 }
 0x10f   : > { %v707_v23 = vpop.f32.mrf.mxu1 }
 0x181   : > { %v486_v24 = vpop.f32.mrf.mxu0 }
 0x182   : > { %v492_v26 = vadd.f32 %v486_v24, %v430_v18 }
 0x183   : > { %v712_v27 = vpop.f32.mrf.mxu0 }
 0x184   : > { %v499_v28 = vadd.f32 %v497_v25, %v492_v26 }
 0x185   : > { %v489_v29 = vpop.f32.mrf.mxu0 }
 0x186   : > { %500 = vst [vmem:[%s323_s26] sm:$0xff] %v499_v28 }
 0x187   : > { %v713_v30 = vpop.f32.mrf.mxu0 }
 0x188   : > { %860 = shalt.err (!%p857_p4)
}
 0x189   : > { %s861_s7 = scalar_lea.hbm %s1127_s17, 128  ;;  %s865_s13 = scalar_lea.hbm %s1179_s4, 256 }
 0x18a   : > { %p862_p7 = scmp.ne.s32.totalorder %s1127_s17, %s861_s7  ;;  %p866_p2 = scmp.lt.s32.totalorder %s1127_s17, %s1179_s4 }
 0x18b   : > { %p867_p8 = scmp.lt.s32.totalorder %s865_s13, %s861_s7 }
 0x18c   : > { %p863_p10 = pnand %p862_p7, %p1019_p9 }
 0x18d   : > { %p868_p0 = por %p867_p8, %p866_p2 }
 0x18e   : > { %p864_p13 = pneg %p863_p10 }
 0x190   : > { %p869_p1 = pnand %p868_p0, %p864_p13 }
 0x192   : > { %872 = shalt.err (!%p869_p1)
}
 0x193   : > { %718 = dma.vmem_to_hbm [thread:$0]  (%p1019_p9), %s1129_s10, 128, %s1127_s17, %s502_s6  }
 0x194 PF: > { %s529_s9 = sand.u32 1, %s911_s15   ;;  %p728_p3 = pnand %p667_p12, %p1026_p11 }
 0x195   : > { %s530_s11 = scalar_lea.sflag [#allocation4], %s529_s9 }
 0x196   : > { %p729_p5 = pneg %p728_p3 }
 0x198   : > { %906 = dma.done.wait (%p729_p5), %s530_s11, 128  }
 0x199   : > { %908 = vsyncadd (%p729_p5), %s530_s11, 4294967168  ;;  %s23_s20 = sadd.s32 1, %s931_s20   ;;  %s1193_s28 = sld [smem:[#allocation11_spill]] }
 0x19a   : > { %p20_p6 = scmp.ge.s32.totalorder %s23_s20, 4   ;;  %s1194_s17 = sld [smem:[#allocation13_spill]] }
 0x19b   : > { %s1195_s21 = sld [smem:[#allocation12_spill]]  ;;  %s1196_s15 = smov %s915_s16 }
 0x19c   : > { %s1198_s18 = smov %s927_s19 }
 0x19d   :  { %22 = sbr.rel (!%p20_p6) target bundleno = 10 (0xa), region = 103 }
 0x19f   : > { %s1197_s16 = smov %s1193_s28 }
 0x1a1   : > { %s1199_s19 = smov %s1195_s21 }
 0x1a2   :  { %535 = vsyncpa [#allocation3], 1 }
 0x1a3   :  { %537 = vsyncpa [#allocation3 + $0x1], 1 }
 0x1a4   :  { %538 = vsyncpa [#allocation6], 1 }
 0x1a5   :  { %540 = vsyncpa [#allocation6 + $0x1], 1 }
 0x1a6   :  { %541 = vsyncpa [#allocation4], 1 }
 0x1a7   :  { %543 = vsyncpa [#allocation4 + $0x1], 1 }

</bundles_post_ra>
